<compile_context>
chip_gen: v5e
topology: v5e:2x2
jax: 0.10.0
libtpu: 0.0.40
codegen_flags: <defaults>
</compile_context>

<pallas_src>
import jax
import jax.numpy as jnp
from jax import lax
from jax.experimental import pallas as pl
from jax.experimental.pallas import tpu as pltpu


def attention_kernel(enc_ref, dec_ref, len_ref, we_ref, wd_ref, v_ref,
                     ctx_ref, attn_ref):
    """One grid step processes TB (padded-)batch elements.

    enc_ref  : VMEM (TB, S, Ep)  encoder_outputs block (E zero-padded to Ep)
    dec_ref  : VMEM (TB, Dp)     decoder_hidden block  (D zero-padded to Dp)
    len_ref  : VMEM (TB, 1)      encoder_lengths block (int32)
    we_ref   : VMEM (Ep, Dp)     W_encoder^T (zero-padded)
    wd_ref   : VMEM (Dp, Dp)     W_decoder^T (zero-padded)
    v_ref    : VMEM (1, Dp)      v as a zero-padded row
    ctx_ref  : VMEM (TB, Ep)     context_vector block
    attn_ref : VMEM (TB, S)      attention_weights block
    """
    TB, S, E = enc_ref.shape
    D = wd_ref.shape[0]

    enc = enc_ref[...]                                            # (TB, S, Ep)

    # One big MXU matmul with M = TB*S rows; Ep/Dp are multiples of 128 so the
    # reshape is a free sublane merge and MXU K/N lanes are fully used.
    enc2d = enc.reshape(TB * S, E)
    enc_proj = jnp.dot(enc2d, we_ref[...],
                       preferred_element_type=jnp.float32)        # (TB*S, Dp)

    # Decoder projection hoisted to the whole block (M = TB, not 1).
    dec_proj = jnp.dot(dec_ref[...], wd_ref[...],
                       preferred_element_type=jnp.float32)        # (TB, Dp)

    # TODO(synk): on v6e/v7x cast to bf16 before tanh (EUP bf16 ~2x) and chunk
    # this region over S with lax.fori_loop at large S to avoid VMEM spills.
    h = jnp.tanh(enc_proj.reshape(TB, S, D) + dec_proj[:, None, :])  # (TB,S,Dp)

    # v-projection as VPU multiply + lane reduce (avoids an N=1 MXU matmul);
    # padded Dp columns of h and v are exactly zero, so the reduce is exact.
    v_row = v_ref[...].reshape(1, 1, D)
    e = jnp.sum(h * v_row, axis=-1)                               # (TB, S)

    # Length mask: position s valid iff s < encoder_lengths[b].  Finite
    # large-negative fill: exp underflows to exactly 0, no inf-inf NaN hazard.
    ids = lax.broadcasted_iota(jnp.int32, (TB, S), 1)
    valid = ids < len_ref[...]                                    # (TB, S)
    e = jnp.where(valid, e, jnp.finfo(jnp.float32).min)

    # Softmax along the lane (S) axis; denominator reciprocal goes to the EUP
    # slot (approx) with one Newton step to recover full f32 accuracy.
    m = jnp.max(e, axis=-1, keepdims=True)
    p = jnp.exp(e - m)
    denom = jnp.sum(p, axis=-1, keepdims=True)
    inv = pl.reciprocal(denom, approx=True)
    inv = inv * (2.0 - denom * inv)
    attn = p * inv                                                # (TB, S)

    # Context as VPU broadcast-multiply + XLU reduce over S (rides slots that
    # have slack here; no TB tiny M=1 matmuls through the MXU result FIFO).
    ctx = jnp.sum(attn[:, :, None] * enc, axis=1)                 # (TB, Ep)

    ctx_ref[...] = ctx.astype(ctx_ref.dtype)
    attn_ref[...] = attn.astype(attn_ref.dtype)


def _round_up(x, m):
    return ((x + m - 1) // m) * m


def _vmem_capacity_bytes():
    """Physical VMEM per TensorCore; conservative fallback if unqueryable."""
    try:
        cap = int(getattr(pltpu.get_tpu_info(), "vmem_capacity_bytes", 0))
        if cap > 0:
            return cap
    except Exception:
        pass
    return 64 * 1024 * 1024  # v7x per-TC size; safe lower bound for v5e/v6e


def _block_vmem_bytes(tb, S, Ep, Dp):
    """Rough per-step VMEM footprint (double-buffered I/O + weights + temps)."""
    f32 = 4
    io = 2 * f32 * (tb * S * Ep + tb * Dp + tb + tb * Ep + tb * S)
    # TODO(synk): give We/Wd/v pipeline_mode=pl.Buffered(1) (constant
    # index_map) to halve their VMEM reservation on v7x at large Ep/Dp.
    weights = 2 * f32 * (Ep * Dp + Dp * Dp + Dp)
    temps = f32 * (2 * tb * S * Dp + tb * S * Ep)  # enc_proj/h + attn*enc
    return io + weights + temps


def _pick_batch_block(B_pad, S, Ep, Dp, vmem_cap):
    """Largest sublane-aligned TB dividing B_pad that fits the VMEM budget,
    preferring >= 2 grid steps so v7x's two TensorCores both get work."""
    budget = max(int(0.45 * vmem_cap), 2 * 1024 * 1024)
    cands = sorted((tb for tb in range(8, B_pad + 1, 8) if B_pad % tb == 0),
                   reverse=True)
    fitting = [tb for tb in cands if _block_vmem_bytes(tb, S, Ep, Dp) <= budget]
    if not fitting:
        return 8
    multi = [tb for tb in fitting if B_pad // tb >= 2]
    return multi[0] if multi else fitting[0]


def attention_pallas(encoder_outputs, decoder_hidden, encoder_lengths,
                     We, Wd, v):
    """Returns (context_vector (B, E), attention_weights (B, S)).

    Weight layout: We (E, D) = W_encoder^T, Wd (D, D) = W_decoder^T,
    v (D, 1) = v^T, so all projections are plain `x @ W`.
    """
    B, S, E = encoder_outputs.shape
    D = Wd.shape[0]

    Ep = _round_up(E, 128)
    Dp = _round_up(D, 128)
    Bp = _round_up(B, 8)

    vmem_cap = _vmem_capacity_bytes()
    TB = _pick_batch_block(Bp, S, Ep, Dp, vmem_cap)
    assert Bp % TB == 0

    f32 = jnp.float32
    # Zero-padding keeps the math exact: padded E/D columns contribute 0 to the
    # projections, tanh(0)=0, padded v entries are 0, and padded batch rows are
    # sliced off below (their length-0 rows stay finite thanks to the finite
    # mask fill).
    enc_p = jnp.pad(encoder_outputs.astype(f32),
                    ((0, Bp - B), (0, 0), (0, Ep - E)))
    dec_p = jnp.pad(decoder_hidden.astype(f32), ((0, Bp - B), (0, Dp - D)))
    len_p = jnp.pad(encoder_lengths.astype(jnp.int32),
                    (0, Bp - B)).reshape(Bp, 1)
    We_p = jnp.pad(We.astype(f32), ((0, Ep - E), (0, Dp - D)))
    Wd_p = jnp.pad(Wd.astype(f32), ((0, Dp - D), (0, Dp - D)))
    v_p = jnp.pad(v.astype(f32).reshape(1, D), ((0, 0), (0, Dp - D)))

    # Advisory cost estimate for XLA's scheduler around the custom call.
    flops = (2 * Bp * S * Ep * Dp + 2 * Bp * Dp * Dp
             + 2 * Bp * S * Dp + 2 * Bp * S * Ep)
    bytes_accessed = 4 * (Bp * S * Ep + Bp * Dp + Bp + Ep * Dp + Dp * Dp
                          + Dp + Bp * Ep + Bp * S)
    cost = pl.CostEstimate(flops=flops,
                           transcendentals=Bp * S * Dp + Bp * S + Bp,
                           bytes_accessed=bytes_accessed)

    # VMEM limit derived from the actual device capacity (valid on v7x's 64 MiB
    # as well as v5e/v6e's 128 MiB), with headroom over the estimated need.
    need = _block_vmem_bytes(TB, S, Ep, Dp)
    vmem_limit = int(min(0.75 * vmem_cap, max(32 * 1024 * 1024, 2 * need)))

    ctx_p, attn_p = pl.pallas_call(
        attention_kernel,
        out_shape=(
            jax.ShapeDtypeStruct((Bp, Ep), jnp.float32),
            jax.ShapeDtypeStruct((Bp, S), jnp.float32),
        ),
        grid_spec=pltpu.PrefetchScalarGridSpec(
            num_scalar_prefetch=0,
            grid=(Bp // TB,),
            in_specs=[
                pl.BlockSpec((TB, S, Ep), lambda b: (b, 0, 0)),
                pl.BlockSpec((TB, Dp), lambda b: (b, 0)),
                pl.BlockSpec((TB, 1), lambda b: (b, 0)),
                pl.BlockSpec((Ep, Dp), lambda b: (0, 0)),
                pl.BlockSpec((Dp, Dp), lambda b: (0, 0)),
                pl.BlockSpec((1, Dp), lambda b: (0, 0)),
            ],
            out_specs=(
                pl.BlockSpec((TB, Ep), lambda b: (b, 0)),
                pl.BlockSpec((TB, S), lambda b: (b, 0)),
            ),
        ),
        compiler_params=pltpu.CompilerParams(
            dimension_semantics=("parallel",),
            vmem_limit_bytes=vmem_limit),
        cost_estimate=cost,
    )(enc_p, dec_p, len_p, We_p, Wd_p, v_p)

    return ctx_p[:B, :E], attn_p[:B, :]


def attention_ref(encoder_outputs, decoder_hidden, encoder_lengths, We, Wd, v):
    """Pure-JAX reference mirroring the PyTorch forward."""
    B, S, E = encoder_outputs.shape
    enc_proj = encoder_outputs @ We                       # (B, S, D)
    dec_proj = decoder_hidden @ Wd                        # (B, D)
    e = jnp.tanh(enc_proj + dec_proj[:, None, :]) @ v     # (B, S, 1)
    e = e[..., 0]
    ids = jnp.arange(S)[None, :]
    mask = ids < encoder_lengths[:, None]
    e = jnp.where(mask, e, -jnp.inf)
    attn = jax.nn.softmax(e, axis=1)
    ctx = jnp.einsum("bs,bse->be", attn, encoder_outputs)
    return ctx, attn


if __name__ == "__main__":
    B, S = 2, 8               # batch, sequence length
    E, D = 32, 32             # encoder_hidden_dim, decoder_hidden_dim

    key = jax.random.PRNGKey(0)
    k_enc, k_dec, k_we, k_wd, k_v = jax.random.split(key, 5)

    encoder_outputs = jax.random.normal(k_enc, (B, S, E), dtype=jnp.float32)
    decoder_hidden = jax.random.normal(k_dec, (B, D), dtype=jnp.float32)
    encoder_lengths = jnp.array([5, 8], dtype=jnp.int32)

    # nn.Linear(in, out, bias=False).weight has shape (out, in); we keep the
    # transposed (in, out) layout so the kernel does plain x @ W.
    We = jax.random.normal(k_we, (E, D), dtype=jnp.float32) * 0.1   # W_encoder^T
    Wd = jax.random.normal(k_wd, (D, D), dtype=jnp.float32) * 0.1   # W_decoder^T
    v = jax.random.normal(k_v, (D, 1), dtype=jnp.float32) * 0.1     # v^T

    ctx, attn = attention_pallas(encoder_outputs, decoder_hidden,
                                 encoder_lengths, We, Wd, v)
    jax.block_until_ready((ctx, attn))

    ctx_r, attn_r = attention_ref(encoder_outputs, decoder_hidden,
                                  encoder_lengths, We, Wd, v)

    assert ctx.shape == (B, E) and attn.shape == (B, S)
    assert jnp.allclose(ctx, ctx_r, atol=1e-4, rtol=1e-4)
    assert jnp.allclose(attn, attn_r, atol=1e-4, rtol=1e-4)
    # masked positions must have exactly zero weight
    assert float(jnp.sum(attn[0, 5:])) == 0.0

    print("KERNEL_OK")
</pallas_src>

<mosaic_0001>
module attributes {stable_mosaic.version = 11 : i64} {
  func.func @attention_kernel(%arg0: i32, %arg1: memref<8x8x128xf32, #tpu.memory_space<vmem>>, %arg2: memref<8x128xf32, #tpu.memory_space<vmem>>, %arg3: memref<8x1xi32, #tpu.memory_space<vmem>>, %arg4: memref<128x128xf32, #tpu.memory_space<vmem>>, %arg5: memref<128x128xf32, #tpu.memory_space<vmem>>, %arg6: memref<1x128xf32, #tpu.memory_space<vmem>>, %arg7: memref<8x128xf32, #tpu.memory_space<vmem>>, %arg8: memref<8x8xf32, #tpu.memory_space<vmem>>) attributes {dimension_semantics = [#tpu.dimension_semantics<parallel>], iteration_bounds = array<i64: 1>, scalar_prefetch = 0 : i64, scratch_operands = 0 : i64, tpu.core_type = #tpu.core_type<tc>, window_params = [{transform_indices = @transform_0, window_bounds = array<i64: 8, 8, 128>}, {transform_indices = @transform_1, window_bounds = array<i64: 8, 128>}, {transform_indices = @transform_2, window_bounds = array<i64: 8, 1>}, {pipeline_mode = #tpu.pipeline_mode<synchronous>, transform_indices = @transform_3, window_bounds = array<i64: 128, 128>}, {pipeline_mode = #tpu.pipeline_mode<synchronous>, transform_indices = @transform_4, window_bounds = array<i64: 128, 128>}, {pipeline_mode = #tpu.pipeline_mode<synchronous>, transform_indices = @transform_5, window_bounds = array<i64: 1, 128>}, {transform_indices = @transform_6, window_bounds = array<i64: 8, 128>}, {transform_indices = @transform_7, window_bounds = array<i64: 8, 8>}]} {
    %c0 = arith.constant 0 : index
    %c0_0 = arith.constant 0 : index
    %c0_1 = arith.constant 0 : index
    %0 = vector.load %arg1[%c0, %c0_0, %c0_1] : memref<8x8x128xf32, #tpu.memory_space<vmem>>, vector<8x8x128xf32>
    %1 = vector.shape_cast %0 : vector<8x8x128xf32> to vector<64x128xf32>
    %c0_2 = arith.constant 0 : index
    %c0_3 = arith.constant 0 : index
    %2 = vector.load %arg4[%c0_2, %c0_3] : memref<128x128xf32, #tpu.memory_space<vmem>>, vector<128x128xf32>
    %cst = arith.constant dense<0.000000e+00> : vector<64x128xf32>
    %3 = tpu.matmul %1, %2, %cst {dimension_numbers = #tpu.dot_dimension_numbers<[1], [0], [0], [1], [0, 0, 1, 1], [], []>} : vector<64x128xf32>, vector<128x128xf32>, vector<64x128xf32> -> vector<64x128xf32>
    %c0_4 = arith.constant 0 : index
    %c0_5 = arith.constant 0 : index
    %4 = vector.load %arg2[%c0_4, %c0_5] : memref<8x128xf32, #tpu.memory_space<vmem>>, vector<8x128xf32>
    %c0_6 = arith.constant 0 : index
    %c0_7 = arith.constant 0 : index
    %5 = vector.load %arg5[%c0_6, %c0_7] : memref<128x128xf32, #tpu.memory_space<vmem>>, vector<128x128xf32>
    %cst_8 = arith.constant dense<0.000000e+00> : vector<8x128xf32>
    %6 = tpu.matmul %4, %5, %cst_8 {dimension_numbers = #tpu.dot_dimension_numbers<[1], [0], [0], [1], [0, 0, 1, 1], [], []>} : vector<8x128xf32>, vector<128x128xf32>, vector<8x128xf32> -> vector<8x128xf32>
    %7 = vector.shape_cast %3 : vector<64x128xf32> to vector<8x8x128xf32>
    %8 = vector.shape_cast %6 : vector<8x128xf32> to vector<8x1x128xf32>
    %9 = vector.broadcast %8 : vector<8x1x128xf32> to vector<8x8x128xf32>
    %10 = arith.addf %7, %9 : vector<8x8x128xf32>
    %11 = math.tanh %10 : vector<8x8x128xf32>
    %c0_9 = arith.constant 0 : index
    %c0_10 = arith.constant 0 : index
    %12 = vector.load %arg6[%c0_9, %c0_10] : memref<1x128xf32, #tpu.memory_space<vmem>>, vector<1x128xf32>
    %13 = vector.shape_cast %12 : vector<1x128xf32> to vector<1x1x128xf32>
    %14 = vector.broadcast %13 : vector<1x1x128xf32> to vector<8x8x128xf32>
    %15 = arith.mulf %11, %14 : vector<8x8x128xf32>
    %cst_11 = arith.constant dense<0.000000e+00> : vector<8x8xf32>
    %16 = vector.multi_reduction <add>, %15, %cst_11 [2] : vector<8x8x128xf32> to vector<8x8xf32>
    %17 = tpu.iota {dimensions = array<i32: 1>} : vector<8x8xi32>
    %c0_12 = arith.constant 0 : index
    %c0_13 = arith.constant 0 : index
    %18 = vector.load %arg3[%c0_12, %c0_13] : memref<8x1xi32, #tpu.memory_space<vmem>>, vector<8x1xi32>
    %19 = vector.broadcast %18 : vector<8x1xi32> to vector<8x8xi32>
    %20 = arith.cmpi slt, %17, %19 : vector<8x8xi32>
    %cst_14 = arith.constant -3.40282347E+38 : f32
    %21 = vector.broadcast %cst_14 : f32 to vector<8x8xf32>
    %22 = arith.select %20, %16, %21 : vector<8x8xi1>, vector<8x8xf32>
    %cst_15 = arith.constant dense<0xFF800000> : vector<8xf32>
    %23 = vector.multi_reduction <maximumf>, %22, %cst_15 [1] : vector<8x8xf32> to vector<8xf32>
    %24 = vector.shape_cast %23 : vector<8xf32> to vector<8x1xf32>
    %25 = vector.broadcast %24 : vector<8x1xf32> to vector<8x8xf32>
    %26 = arith.subf %22, %25 : vector<8x8xf32>
    %27 = math.exp %26 : vector<8x8xf32>
    %cst_16 = arith.constant dense<0.000000e+00> : vector<8xf32>
    %28 = vector.multi_reduction <add>, %27, %cst_16 [1] : vector<8x8xf32> to vector<8xf32>
    %29 = vector.shape_cast %28 : vector<8xf32> to vector<8x1xf32>
    %30 = tpu.reciprocal %29 {approx = true} : vector<8x1xf32> -> vector<8x1xf32>
    %31 = arith.mulf %29, %30 : vector<8x1xf32>
    %cst_17 = arith.constant 2.000000e+00 : f32
    %32 = vector.broadcast %cst_17 : f32 to vector<8x1xf32>
    %33 = arith.subf %32, %31 : vector<8x1xf32>
    %34 = arith.mulf %30, %33 : vector<8x1xf32>
    %35 = vector.broadcast %34 : vector<8x1xf32> to vector<8x8xf32>
    %36 = arith.mulf %27, %35 : vector<8x8xf32>
    %37 = vector.shape_cast %36 : vector<8x8xf32> to vector<8x8x1xf32>
    %38 = vector.broadcast %37 : vector<8x8x1xf32> to vector<8x8x128xf32>
    %39 = arith.mulf %38, %0 : vector<8x8x128xf32>
    %cst_18 = arith.constant dense<0.000000e+00> : vector<8x128xf32>
    %40 = vector.multi_reduction <add>, %39, %cst_18 [1] : vector<8x8x128xf32> to vector<8x128xf32>
    %c0_19 = arith.constant 0 : index
    %c0_20 = arith.constant 0 : index
    %41 = vector.load %arg7[%c0_19, %c0_20] : memref<8x128xf32, #tpu.memory_space<vmem>>, vector<8x128xf32>
    tpu.vector_store %arg7[%c0_19, %c0_20], %40 {strides = array<i32>} : memref<8x128xf32, #tpu.memory_space<vmem>>, vector<8x128xf32>,
    %c0_21 = arith.constant 0 : index
    %c0_22 = arith.constant 0 : index
    %42 = vector.load %arg8[%c0_21, %c0_22] : memref<8x8xf32, #tpu.memory_space<vmem>>, vector<8x8xf32>
    tpu.vector_store %arg8[%c0_21, %c0_22], %36 {strides = array<i32>} : memref<8x8xf32, #tpu.memory_space<vmem>>, vector<8x8xf32>,
    return
  }
  func.func @transform_0(%arg0: i32) -> (i32, i32, i32) {
    %c0_i32 = arith.constant 0 : i32
    %c0_i32_0 = arith.constant 0 : i32
    %c0_i32_1 = arith.constant 0 : i32
    return %arg0, %c0_i32, %c0_i32_0 : i32, i32, i32
  }
  func.func @transform_1(%arg0: i32) -> (i32, i32) {
    %c0_i32 = arith.constant 0 : i32
    %c0_i32_0 = arith.constant 0 : i32
    return %arg0, %c0_i32 : i32, i32
  }
  func.func @transform_2(%arg0: i32) -> (i32, i32) {
    %c0_i32 = arith.constant 0 : i32
    %c0_i32_0 = arith.constant 0 : i32
    return %arg0, %c0_i32 : i32, i32
  }
  func.func @transform_3(%arg0: i32) -> (i32, i32) {
    %c0_i32 = arith.constant 0 : i32
    %c0_i32_0 = arith.constant 0 : i32
    %c0_i32_1 = arith.constant 0 : i32
    return %c0_i32, %c0_i32_0 : i32, i32
  }
  func.func @transform_4(%arg0: i32) -> (i32, i32) {
    %c0_i32 = arith.constant 0 : i32
    %c0_i32_0 = arith.constant 0 : i32
    %c0_i32_1 = arith.constant 0 : i32
    return %c0_i32, %c0_i32_0 : i32, i32
  }
  func.func @transform_5(%arg0: i32) -> (i32, i32) {
    %c0_i32 = arith.constant 0 : i32
    %c0_i32_0 = arith.constant 0 : i32
    %c0_i32_1 = arith.constant 0 : i32
    return %c0_i32, %c0_i32_0 : i32, i32
  }
  func.func @transform_6(%arg0: i32) -> (i32, i32) {
    %c0_i32 = arith.constant 0 : i32
    %c0_i32_0 = arith.constant 0 : i32
    return %arg0, %c0_i32 : i32, i32
  }
  func.func @transform_7(%arg0: i32) -> (i32, i32) {
    %c0_i32 = arith.constant 0 : i32
    %c0_i32_0 = arith.constant 0 : i32
    return %arg0, %c0_i32 : i32, i32
  }
}

</mosaic_0001>

<bundles_post_ra>
// kernel: tpu_custom_call.1
= control target key start
LH: loop header
LB: loop body
LE: loop exit
PB: predicated region body
PF: predicated region fallthrough
CT: control target
= control target key end

     0   :  { %13 = vsyncpa [#allocation3], 0  ;;  %s776_s0 = inlined_call_operand.hbm [shape: f32[8,8,128], index: 0, kind: input, shape index: {}]   ;;  %s777_s1 = inlined_call_operand.vmem [shape: f32[8,128], index: 1, kind: input, shape index: {}]   ;;  %s778_s2 = inlined_call_operand.vmem [shape: s32[8,1], index: 2, kind: input, shape index: {}]   ;;  %s779_s3 = inlined_call_operand.hbm [shape: f32[128,128], index: 3, kind: input, shape index: {}]   ;;  %s780_s4 = inlined_call_operand.hbm [shape: f32[128,128], index: 4, kind: input, shape index: {}]   ;;  %s781_s5 = inlined_call_operand.vmem [shape: f32[1,128], index: 5, kind: input, shape index: {}]   ;;  %s782_s6 = inlined_call_operand.hbm [shape: f32[8,128], index: 6, kind: output, shape index: {0}]   ;;  %s783_s7 = inlined_call_operand.hbm [shape: f32[8,8], index: 7, kind: output, shape index: {1}]  }
   0x1   :  { %14 = vsyncpa [#allocation6], 0 }
   0x2   :  { %15 = vsyncpa [#allocation4], 0 }
   0x3   :  { %16 = vsyncpa [#allocation10], 0  ;;  %s38_s26 = sshll.u32 %s779_s3, 4  ;;  %s655_s27 = smov [#allocation5]   ;;  %s39_s26 = int_to_ptr.hbm [resolvable:$true] %s38_s26 }
   0x4   :  { %s40_s28 = sshll.u32 %s655_s27, 4  ;;  %s21_s8 = sshll.u32 %s776_s0, 4  ;;  %s41_s28 = int_to_ptr.vmem [resolvable:$true] %s40_s28  ;;  %s22_s8 = int_to_ptr.hbm [resolvable:$true] %s21_s8 }
   0x5   :  { %s656_s9 = smov 128   ;;  %s657_s10 = smov 8  }
   0x6   :  { %46 = dma.hbm_to_vmem [thread:$0]  %s39_s26, 2048, %s41_s28, [#allocation6], %s656_s9, %s656_s9, %s657_s10  }
   0x7   :  { %s658_s11 = smov [#allocation2]   ;;  %s51_s15 = sshll.u32 %s780_s4, 4  ;;  %s52_s15 = int_to_ptr.hbm [resolvable:$true] %s51_s15 }
   0x8   :  { %s23_s12 = sshll.u32 %s658_s11, 4  ;;  %s659_s3 = smov [#allocation7]   ;;  %s24_s12 = int_to_ptr.vmem [resolvable:$true] %s23_s12 }
   0x9   :  { %29 = dma.hbm_to_vmem [thread:$0]  %s22_s8, 1024, %s24_s12, [#allocation3], %s656_s9, %s656_s9, %s657_s10  }
   0xa   :  { %s53_s16 = sshll.u32 %s659_s3, 4  ;;  %s54_s16 = int_to_ptr.vmem [resolvable:$true] %s53_s16 }
   0xb   :  { %59 = dma.hbm_to_vmem [thread:$0]  %s52_s15, 2048, %s54_s16, [#allocation6], %s656_s9, %s656_s9, %s657_s10  }
   0xc   :  { %647 = dma.done.wait [#allocation3], 1024  }
   0xd   :  { %648 = vsyncadd [#allocation3], 4294966272 }
   0xe   :  { %649 = dma.done.wait [#allocation6], 4096  }
   0xf   :  { %650 = vsyncadd [#allocation6], 4294963200  ;;  %v97_v0 = vld [vmem:[#allocation5 + $0x78] sm:$0xff]  ;;  %v96_v2 = vld [vmem:[#allocation5 + $0x70] sm:$0xff]  ;;  %v660_v53 = vmov 0   ;;  %vm267_vm0 = vcmask 1041409  }
  0x10   :  { %v155_v1 = vld [vmem:[#allocation7 + $0x78] sm:$0xff]  ;;  %462 = vmatpush.msra.mxu2 %v97_v0  ;;  %463 = vmatpush.msra.mxu3 %v97_v0  ;;  %v154_v3 = vld [vmem:[#allocation7 + $0x70] sm:$0xff]  ;;  %v95_v4 = vld [vmem:[#allocation5 + $0x68] sm:$0xff]  ;;  %vm269_vm1 = vcmask 1042434   ;;  %vm271_vm2 = vcmask 1043459   ;;  %vm273_vm3 = vcmask 1044484  }
  0x11   :  { %156 = vmatpush.msra.mxu1 %v155_v1  ;;  %98 = vmatpush.msra.mxu0 %v97_v0  ;;  %v153_v5 = vld [vmem:[#allocation7 + $0x68] sm:$0xff]  ;;  %v94_v6 = vld [vmem:[#allocation5 + $0x60] sm:$0xff]  ;;  %v93_v8 = vld [vmem:[#allocation5 + $0x58] sm:$0xff]  ;;  %vm275_vm4 = vcmask 1045509   ;;  %vm277_vm5 = vcmask 1046534   ;;  %vm279_vm6 = vcmask 1047559  }
  0x12   :  { %464 = vmatpush.msra.mxu2 %v96_v2  ;;  %465 = vmatpush.msra.mxu3 %v96_v2  ;;  %v152_v7 = vld [vmem:[#allocation7 + $0x60] sm:$0xff]  ;;  %v151_v9 = vld [vmem:[#allocation7 + $0x58] sm:$0xff]  ;;  %v92_v10 = vld [vmem:[#allocation5 + $0x50] sm:$0xff]  ;;  %vm283_vm7 = vcmask 64512   ;;  %s446_s22 = sshll.u32 %s783_s7, 4  ;;  %s662_s7 = smov [#allocation8]   ;;  %s447_s22 = int_to_ptr.hbm [resolvable:$true] %s446_s22 }
  0x13   :  { %157 = vmatpush.msra.mxu1 %v154_v3  ;;  %99 = vmatpush.msra.mxu0 %v96_v2  ;;  %v150_v11 = vld [vmem:[#allocation7 + $0x50] sm:$0xff]  ;;  %v91_v12 = vld [vmem:[#allocation5 + $0x48] sm:$0xff]  ;;  %v90_v14 = vld [vmem:[#allocation5 + $0x40] sm:$0xff]  ;;  %s433_s23 = sshll.u32 %s662_s7, 4  ;;  %s435_s26 = sshll.u32 %s782_s6, 4  ;;  %s434_s23 = int_to_ptr.vmem [resolvable:$true] %s433_s23  ;;  %s436_s26 = int_to_ptr.hbm [resolvable:$true] %s435_s26 }
  0x14   :  { %466 = vmatpush.msra.mxu2 %v95_v4  ;;  %467 = vmatpush.msra.mxu3 %v95_v4  ;;  %v149_v13 = vld [vmem:[#allocation7 + $0x48] sm:$0xff]  ;;  %v148_v15 = vld [vmem:[#allocation7 + $0x40] sm:$0xff]  ;;  %v89_v16 = vld [vmem:[#allocation5 + $0x38] sm:$0xff] }
  0x15   :  { %158 = vmatpush.msra.mxu1 %v153_v5  ;;  %100 = vmatpush.msra.mxu0 %v95_v4  ;;  %v147_v17 = vld [vmem:[#allocation7 + $0x38] sm:$0xff]  ;;  %v88_v18 = vld [vmem:[#allocation5 + $0x30] sm:$0xff]  ;;  %v87_v20 = vld [vmem:[#allocation5 + $0x28] sm:$0xff] }
  0x16   :  { %468 = vmatpush.msra.mxu2 %v94_v6  ;;  %469 = vmatpush.msra.mxu3 %v94_v6  ;;  %v146_v19 = vld [vmem:[#allocation7 + $0x30] sm:$0xff]  ;;  %v145_v21 = vld [vmem:[#allocation7 + $0x28] sm:$0xff]  ;;  %v86_v22 = vld [vmem:[#allocation5 + $0x20] sm:$0xff] }
  0x17   :  { %159 = vmatpush.msra.mxu1 %v152_v7  ;;  %101 = vmatpush.msra.mxu0 %v94_v6  ;;  %v144_v23 = vld [vmem:[#allocation7 + $0x20] sm:$0xff]  ;;  %v85_v24 = vld [vmem:[#allocation5 + $0x18] sm:$0xff]  ;;  %v84_v26 = vld [vmem:[#allocation5 + $0x10] sm:$0xff] }
  0x18   :  { %470 = vmatpush.msra.mxu2 %v93_v8  ;;  %471 = vmatpush.msra.mxu3 %v93_v8  ;;  %v143_v25 = vld [vmem:[#allocation7 + $0x18] sm:$0xff]  ;;  %v142_v27 = vld [vmem:[#allocation7 + $0x10] sm:$0xff]  ;;  %v83_v28 = vld [vmem:[#allocation5 + $0x8] sm:$0xff] }
  0x19   :  { %160 = vmatpush.msra.mxu1 %v151_v9  ;;  %102 = vmatpush.msra.mxu0 %v93_v8  ;;  %v141_v29 = vld [vmem:[#allocation7 + $0x8] sm:$0xff]  ;;  %v82_v30 = vld [vmem:[#allocation5] sm:$0xff]  ;;  %v712_v32 = vld [vmem:[#allocation2 + $0x10] sm:$0xff] }
  0x1a   :  { %472 = vmatpush.msra.mxu2 %v92_v10  ;;  %473 = vmatpush.msra.mxu3 %v92_v10  ;;  %v140_v31 = vld [vmem:[#allocation7] sm:$0xff]  ;;  %v714_v33 = vld [vmem:[#allocation2 + $0x28] sm:$0xff]  ;;  %v724_v36 = vld [vmem:[#allocation2 + $0x18] sm:$0xff] }
  0x1b   :  { %161 = vmatpush.msra.mxu1 %v150_v11  ;;  %103 = vmatpush.msra.mxu0 %v92_v10  ;;  %v139_v34 = vld [vmem:[%s777_s1] sm:$0xff]  ;;  %v726_v37 = vld [vmem:[#allocation2 + $0x30] sm:$0xff]  ;;  %v729_v38 = vld [vmem:[#allocation2 + $0x8] sm:$0xff] }
  0x1c   :  { %474 = vmatpush.msra.mxu2 %v91_v12  ;;  %475 = vmatpush.msra.mxu3 %v91_v12  ;;  %v720_v35 = vld [vmem:[#allocation2] sm:$0xff]  ;;  %v735_v40 = vld [vmem:[#allocation2 + $0x38] sm:$0xff] }
  0x1d   :  { %162 = vmatpush.msra.mxu1 %v149_v13  ;;  %104 = vmatpush.msra.mxu0 %v91_v12  ;;  %v733_v39 = vld [vmem:[#allocation2 + $0x20] sm:$0xff] }
  0x1e   :  { %476 = vmatpush.msra.mxu2 %v90_v14  ;;  %477 = vmatpush.msra.mxu3 %v90_v14  ;;  %v506_v57 = vld [vmem:[%s781_s5] ss:$0 sm:$0xff] }
  0x1f   :  { %163 = vmatpush.msra.mxu1 %v148_v15  ;;  %105 = vmatpush.msra.mxu0 %v90_v14 }
  0x20   :  { %478 = vmatpush.msra.mxu2 %v89_v16  ;;  %479 = vmatpush.msra.mxu3 %v89_v16 }
  0x21   :  { %164 = vmatpush.msra.mxu1 %v147_v17  ;;  %106 = vmatpush.msra.mxu0 %v89_v16 }
  0x22   :  { %480 = vmatpush.msra.mxu2 %v88_v18  ;;  %481 = vmatpush.msra.mxu3 %v88_v18 }
  0x23   :  { %165 = vmatpush.msra.mxu1 %v146_v19  ;;  %107 = vmatpush.msra.mxu0 %v88_v18 }
  0x24   :  { %482 = vmatpush.msra.mxu2 %v87_v20  ;;  %483 = vmatpush.msra.mxu3 %v87_v20 }
  0x25   :  { %166 = vmatpush.msra.mxu1 %v145_v21  ;;  %108 = vmatpush.msra.mxu0 %v87_v20 }
  0x26   :  { %484 = vmatpush.msra.mxu2 %v86_v22  ;;  %485 = vmatpush.msra.mxu3 %v86_v22 }
  0x27   :  { %167 = vmatpush.msra.mxu1 %v144_v23  ;;  %109 = vmatpush.msra.mxu0 %v86_v22 }
  0x28   :  { %486 = vmatpush.msra.mxu2 %v85_v24  ;;  %487 = vmatpush.msra.mxu3 %v85_v24 }
  0x29   :  { %168 = vmatpush.msra.mxu1 %v143_v25  ;;  %110 = vmatpush.msra.mxu0 %v85_v24 }
  0x2a   :  { %488 = vmatpush.msra.mxu2 %v84_v26  ;;  %489 = vmatpush.msra.mxu3 %v84_v26 }
  0x2b   :  { %169 = vmatpush.msra.mxu1 %v142_v27  ;;  %111 = vmatpush.msra.mxu0 %v84_v26  ;;  %v246_v27 = vld [vmem:[%s778_s2] sm:$0xff]  ;;  %s661_s2 = smov [#allocation9]  }
  0x2c   :  { %490 = vmatpush.msra.mxu2 %v83_v28  ;;  %491 = vmatpush.msra.mxu3 %v83_v28  ;;  %s444_s19 = sshll.u32 %s661_s2, 4  ;;  %s445_s19 = int_to_ptr.vmem [resolvable:$true] %s444_s19 }
  0x2d   :  { %170 = vmatpush.msra.mxu1 %v141_v29  ;;  %112 = vmatpush.msra.mxu0 %v83_v28 }
  0x2e   :  { %492 = vmatpush.msra.mxu2 %v82_v30  ;;  %493 = vmatpush.msra.mxu3 %v82_v30 }
  0x2f   :  { %171 = vmatpush.msra.mxu1 %v140_v31  ;;  %120 = vmatmul.f32.vlgmr.msra.gmra.mxu2 %v712_v32 }
  0x30   :  { %129 = vmatmul.f32.vlgmr.msra.gmra.mxu3 %v714_v33  ;;  %172 = vmatmul.f32.vlgmr.msra.gmra.mxu1 %v139_v34 }
  0x31   :  { %113 = vmatpush.msra.mxu0 %v82_v30  ;;  %502 = vset.pattern.permute.xlu2 %v660_v53  ;;  %v244_v30 = vlaneseq }
  0x32   :  { %114 = vmatmul.f32.vlgmr.msra.gmra.mxu0 %v720_v35 }
  0x33   :  { %v245_v34 = vand.u32 127, %v244_v30 }
  0x37   :  { %123 = vmatmul.f32.gmra.mxu2 %v724_v36 }
  0x38   :  { %132 = vmatmul.f32.gmra.mxu3 %v726_v37 }
  0x3a   :  { %117 = vmatmul.f32.gmra.mxu0 %v729_v38 }
  0x3f   :  { %126 = vmatmul.f32.gmra.mxu2 %v733_v39 }
  0x40   :  { %135 = vmatmul.f32.gmra.mxu3 %v735_v40 }
  0xad   :  { %v173_v41 = vpop.f32.mrf.mxu1 }
  0xae   :  { %v184_v42 = vperm.slane %v173_v41, 0  ;;  %v178_v43 = vrot.slane %v173_v41, 2  ;;  %v181_v44 = vrot.slane %v173_v41, 5  ;;  %v177_v49 = vrot.slane %v173_v41, 1 }
  0xaf   :  { %v115_v45 = vpop.f32.mrf.mxu0  ;;  %v179_v56 = vrot.slane %v173_v41, 3  ;;  %v182_v58 = vrot.slane %v173_v41, 6  ;;  %v180_v8 = vrot.slane %v173_v41, 4  ;;  %v183_v10 = vrot.slane %v173_v41, 7 }
  0xb0   :  { %v200_v46 = vadd.f32 %v184_v42, %v115_v45  ;;  %v186_v47 = vperm.slane %v178_v43, 0  ;;  %v189_v48 = vperm.slane %v181_v44, 0  ;;  %v185_v55 = vperm.slane %v177_v49, 0 }
  0xb1   :  { %v187_v62 = vperm.slane %v179_v56, 0  ;;  %v190_v1 = vperm.slane %v182_v58, 0  ;;  %v188_v12 = vperm.slane %v180_v8, 0  ;;  %v191_v15 = vperm.slane %v183_v10, 0 }
  0xb2   :  { %507 = vtanh.f32 %v200_v46  ;;  %v121_v50 = vpop.f32.mrf.mxu2 }
  0xb3   :  { %v202_v51 = vadd.f32 %v186_v47, %v121_v50  ;;  %v130_v52 = vpop.f32.mrf.mxu3 }
  0xb4   :  { %v205_v54 = vadd.f32 %v189_v48, %v130_v52 }
  0xb5   :  { %509 = vtanh.f32 %v202_v51 }
  0xb6   :  { %511 = vtanh.f32 %v205_v54 }
  0xb7   :  { %v118_v59 = vpop.f32.mrf.mxu0 }
  0xb8   :  { %v508_v60 = vpop.eup %507  ;;  %v201_v61 = vadd.f32 %v185_v55, %v118_v59 }
  0xb9   :  { %v220_v63 = vmul.f32 %v508_v60, %v506_v57 }
  0xba   :  { %513 = vtanh.f32 %v201_v61  ;;  %v124_v0 = vpop.f32.mrf.mxu2 }
  0xbb   :  { %v510_v2 = vpop.eup %509  ;;  %v203_v3 = vadd.f32 %v187_v62, %v124_v0  ;;  %v133_v4 = vpop.f32.mrf.mxu3  ;;  %228 = vadd.xlane.f32.xlu0 %v220_v63 }
  0xbc   :  { %v512_v5 = vpop.eup %511  ;;  %v206_v6 = vadd.f32 %v190_v1, %v133_v4  ;;  %v222_v7 = vmul.f32 %v510_v2, %v506_v57 }
  0xbd   :  { %515 = vtanh.f32 %v203_v3  ;;  %v225_v9 = vmul.f32 %v512_v5, %v506_v57  ;;  %v300_v5 = vshrl.u32 %v244_v30, 7 }
  0xbe   :  { %232 = vadd.xlane.f32.xlu1 %v222_v7  ;;  %517 = vtanh.f32 %v206_v6 }
  0xbf   :  { %238 = vadd.xlane.f32.xlu2 %v225_v9  ;;  %504 = vset.pattern.permute.xlu1 %v300_v5 }
  0xc0   :  { %v514_v11 = vpop.eup %513  ;;  %503 = vset.pattern.permute.xlu0 %v300_v5 }
  0xc1   :  { %v221_v13 = vmul.f32 %v514_v11, %v506_v57 }
  0xc2   :  { %v127_v14 = vpop.f32.mrf.mxu2 }
  0xc3   :  { %v516_v16 = vpop.eup %515  ;;  %v204_v17 = vadd.f32 %v188_v12, %v127_v14  ;;  %v136_v18 = vpop.f32.mrf.mxu3  ;;  %230 = vadd.xlane.f32.xlu0 %v221_v13 }
  0xc4   :  { %v207_v19 = vadd.f32 %v191_v15, %v136_v18  ;;  %v223_v20 = vmul.f32 %v516_v16, %v506_v57  ;;  %v518_v21 = vpop.eup %517 }
  0xc5   :  { %519 = vtanh.f32 %v204_v17  ;;  %v226_v22 = vmul.f32 %v518_v21, %v506_v57 }
  0xc6   :  { %521 = vtanh.f32 %v207_v19  ;;  %234 = vadd.xlane.f32.xlu1 %v223_v20 }
  0xcb   :  { %v520_v23 = vpop.eup %519  ;;  %240 = vadd.xlane.f32.xlu0 %v226_v22 }
  0xcc   :  { %v522_v24 = vpop.eup %521  ;;  %v224_v25 = vmul.f32 %v520_v23, %v506_v57 }
  0xcd   :  { %v227_v26 = vmul.f32 %v522_v24, %v506_v57 }
  0xce   :  { %236 = vadd.xlane.f32.xlu2 %v224_v25 }
  0xcf   :  { %242 = vadd.xlane.f32.xlu1 %v227_v26 }
  0xe6   :  { %248 = vperm.xlu2 %502, %v246_v27  }
  0xee   :  { %505 = vset.pattern.permute.xlu2 %v300_v5 }
 0x12e   :  { %v229_v28 = vpop.xlane.xlu0 %228 }
 0x12f   :  { %v259_v42 = vperm.slane %v229_v28, %v245_v34 }
 0x131   :  { %v233_v29 = vpop.xlane.xlu1 %232 }
 0x132   :  { %v239_v41 = vpop.xlane.xlu2 %238  ;;  %v261_v47 = vperm.slane %v233_v29, %v245_v34 }
 0x133   :  { %v264_v52 = vperm.slane %v239_v41, %v245_v34 }
 0x136   :  { %v231_v31 = vpop.xlane.xlu0 %230 }
 0x137   :  { %v260_v43 = vperm.slane %v231_v31, %v245_v34 }
 0x139   :  { %v235_v44 = vpop.xlane.xlu1 %234  ;;  %v268_v45 = vsel %vm267_vm0, %v260_v43, %v259_v42 }
 0x13a   :  { %v262_v46 = vperm.slane %v235_v44, %v245_v34  ;;  %v270_v49 = vsel %vm269_vm1, %v261_v47, %v268_v45 }
 0x13c   :  { %v272_v53 = vsel %vm271_vm2, %v262_v46, %v270_v49 }
 0x13e   :  { %v241_v50 = vpop.xlane.xlu0 %240 }
 0x13f   :  { %v265_v55 = vperm.slane %v241_v50, %v245_v34 }
 0x141   :  { %v237_v48 = vpop.xlane.xlu2 %236 }
 0x142   :  { %v263_v51 = vperm.slane %v237_v48, %v245_v34  ;;  %v243_v56 = vpop.xlane.xlu1 %242 }
 0x143   :  { %v266_v59 = vperm.slane %v243_v56, %v245_v34 }
 0x144   :  { %v274_v54 = vsel %vm273_vm3, %v263_v51, %v272_v53 }
 0x145   :  { %v276_v57 = vsel %vm275_vm4, %v264_v52, %v274_v54 }
 0x146   :  { %v278_v58 = vsel %vm277_vm5, %v265_v55, %v276_v57 }
 0x147   :  { %v280_v61 = vsel %vm279_vm6, %v266_v59, %v278_v58 }
 0x149   :  { %v249_v60 = vpop.permute.xlu2 %248 }
 0x14a   :  { %vm250_vm8 = vcmp.lt.s32.totalorder %v245_v34, %v249_v60 }
 0x14b   :  { %v282_v62 = vsel %vm250_vm8, %v280_v61, -3.4028235e+38 }
 0x14c   :  { %v284_v63 = vsel %vm283_vm7, %v282_v62, -inf }
 0x14d   :  { %285 = vmax.xlane.f32.xlu0 %v284_v63 }
 0x1c0   :  { %v286_v0 = vpop.xlane.xlu0 %285 }
 0x1c1   :  { %v287_v1 = vsub.f32 %v282_v62, %v286_v0 }
 0x1c3   :  { %v288_v2 = vmul.f32 1.442695, %v287_v1 }
 0x1c5   :  { %523 = vpow2.f32 %v288_v2 }
 0x1cb   :  { %v524_v3 = vpop.eup %523 }
 0x1cc   :  { %v290_v4 = vsel %vm283_vm7, %v524_v3, 0.0 }
 0x1cd   :  { %291 = vadd.xlane.f32.xlu1 %v290_v4 }
 0x240   :  { %v292_v6 = vpop.xlane.xlu1 %291 }
 0x241   :  { %525 = vrcp.f32 %v292_v6 }
 0x247   :  { %v526_v7 = vpop.eup %525 }
 0x248   :  { %v294_v8 = vmul.f32 %v526_v7, %v292_v6 }
 0x24a   :  { %v295_v9 = vsub.f32 2.0, %v294_v8 }
 0x24c   :  { %v296_v10 = vmul.f32 %v526_v7, %v295_v9 }
 0x24e   :  { %v297_v11 = vmul.f32 %v524_v3, %v296_v10 }
 0x250   :  { %427 = vst.msk [vmem:[#allocation9] sm:$0xff] %vm283_vm7, %v297_v11  ;;  %v312_v12 = vperm.slane %v297_v11, 2  ;;  %v305_v13 = vperm.slane %v297_v11, 1  ;;  %v298_v14 = vperm.slane %v297_v11, 0  ;;  %v319_v15 = vperm.slane %v297_v11, 3 }
 0x251   :  { %v333_v16 = vperm.slane %v297_v11, 5  ;;  %v326_v17 = vperm.slane %v297_v11, 4  ;;  %v347_v18 = vperm.slane %v297_v11, 7  ;;  %v340_v19 = vperm.slane %v297_v11, 6  ;;  %449 = dma.vmem_to_hbm [thread:$0]  %s445_s19, 128, %s447_s22, [#allocation10]  }
 0x252   :  { %317 = vperm.xlu2 %505, %v312_v12   ;;  %310 = vperm.xlu1 %504, %v305_v13  }
 0x253   :  { %303 = vperm.xlu0 %503, %v298_v14  }
 0x25a   :  { %324 = vperm.xlu2 %505, %v319_v15   ;;  %338 = vperm.xlu1 %504, %v333_v16  }
 0x262   :  { %331 = vperm.xlu2 %505, %v326_v17   ;;  %352 = vperm.xlu1 %504, %v347_v18  }
 0x26a   :  { %345 = vperm.xlu2 %505, %v340_v19  }
 0x2ac   :  { %v318_v20 = vpop.permute.xlu2 %317 }
 0x2ad   :  { %v356_v23 = vmul.f32 %v318_v20, %v712_v32 }
 0x2af   :  { %v374_v25 = vrot.slane %v356_v23, 4 }
 0x2b1   :  { %v375_v34 = vadd.f32 %v374_v25, %v356_v23 }
 0x2b4   :  { %v325_v21 = vpop.permute.xlu2 %324 }
 0x2b5   :  { %v357_v24 = vmul.f32 %v325_v21, %v724_v36  ;;  %v376_v36 = vrot.slane %v375_v34, 2 }
 0x2b7   :  { %v380_v28 = vrot.slane %v357_v24, 4  ;;  %v377_v54 = vadd.f32 %v376_v36, %v375_v34 }
 0x2b9   :  { %v381_v32 = vadd.f32 %v380_v28, %v357_v24  ;;  %v378_v62 = vrot.slane %v377_v54, 1 }
 0x2bb   :  { %v382_v52 = vrot.slane %v381_v32, 2  ;;  %v379_v7 = vadd.f32 %v378_v62, %v377_v54 }
 0x2bc   :  { %v332_v22 = vpop.permute.xlu2 %331 }
 0x2bd   :  { %v358_v26 = vmul.f32 %v332_v22, %v733_v39  ;;  %v383_v59 = vadd.f32 %v382_v52, %v381_v32 }
 0x2bf   :  { %v386_v43 = vrot.slane %v358_v26, 4  ;;  %v384_v4 = vrot.slane %v383_v59, 1 }
 0x2c1   :  { %v387_v39 = vadd.f32 %v386_v43, %v358_v26  ;;  %v385_v13 = vadd.f32 %v384_v4, %v383_v59 }
 0x2c3   :  { %v388_v57 = vrot.slane %v387_v39, 2 }
 0x2c4   :  { %v311_v27 = vpop.permute.xlu1 %310  ;;  %v346_v29 = vpop.permute.xlu2 %345 }
 0x2c5   :  { %v355_v30 = vmul.f32 %v311_v27, %v729_v38  ;;  %v304_v31 = vpop.permute.xlu0 %303  ;;  %v360_v44 = vmul.f32 %v346_v29, %v726_v37  ;;  %v389_v1 = vadd.f32 %v388_v57, %v387_v39 }
 0x2c6   :  { %v354_v41 = vmul.f32 %v304_v31, %v720_v35 }
 0x2c7   :  { %v368_v42 = vrot.slane %v355_v30, 4  ;;  %v398_v49 = vrot.slane %v360_v44, 4  ;;  %v390_v10 = vrot.slane %v389_v1, 1 }
 0x2c8   :  { %v362_v45 = vrot.slane %v354_v41, 4 }
 0x2c9   :  { %v369_v46 = vadd.f32 %v368_v42, %v355_v30  ;;  %v399_v37 = vadd.f32 %v398_v49, %v360_v44  ;;  %v391_v18 = vadd.f32 %v390_v10, %v389_v1 }
 0x2ca   :  { %v363_v47 = vadd.f32 %v362_v45, %v354_v41 }
 0x2cb   :  { %v370_v48 = vrot.slane %v369_v46, 2  ;;  %v400_v2 = vrot.slane %v399_v37, 2 }
 0x2cc   :  { %v364_v50 = vrot.slane %v363_v47, 2  ;;  %v339_v51 = vpop.permute.xlu1 %338 }
 0x2cd   :  { %v371_v38 = vadd.f32 %v370_v48, %v369_v46  ;;  %v359_v53 = vmul.f32 %v339_v51, %v714_v33  ;;  %v401_v11 = vadd.f32 %v400_v2, %v399_v37 }
 0x2ce   :  { %v365_v35 = vadd.f32 %v364_v50, %v363_v47 }
 0x2cf   :  { %v372_v55 = vrot.slane %v371_v38, 1  ;;  %v392_v56 = vrot.slane %v359_v53, 4  ;;  %v402_v19 = vrot.slane %v401_v11, 1 }
 0x2d0   :  { %v366_v58 = vrot.slane %v365_v35, 1 }
 0x2d1   :  { %v373_v60 = vadd.f32 %v372_v55, %v371_v38  ;;  %v393_v61 = vadd.f32 %v392_v56, %v359_v53  ;;  %v403_v23 = vadd.f32 %v402_v19, %v401_v11 }
 0x2d2   :  { %v367_v63 = vadd.f32 %v366_v58, %v365_v35 }
 0x2d3   :  { %v394_v0 = vrot.slane %v393_v61, 2 }
 0x2d4   :  { %v353_v3 = vpop.permute.xlu1 %352  ;;  %v418_v5 = vsel %vm267_vm0, %v373_v60, %v367_v63 }
 0x2d5   :  { %v395_v33 = vadd.f32 %v394_v0, %v393_v61  ;;  %v361_v6 = vmul.f32 %v353_v3, %v735_v40  ;;  %v419_v12 = vsel %vm269_vm1, %v379_v7, %v418_v5 }
 0x2d6   :  { %v420_v17 = vsel %vm271_vm2, %v385_v13, %v419_v12 }
 0x2d7   :  { %v396_v8 = vrot.slane %v395_v33, 1  ;;  %v404_v9 = vrot.slane %v361_v6, 4  ;;  %v421_v21 = vsel %vm273_vm3, %v391_v18, %v420_v17 }
 0x2d9   :  { %v405_v14 = vadd.f32 %v404_v9, %v361_v6  ;;  %v397_v15 = vadd.f32 %v396_v8, %v395_v33 }
 0x2db   :  { %v406_v16 = vrot.slane %v405_v14, 2  ;;  %v422_v40 = vsel %vm275_vm4, %v397_v15, %v421_v21 }
 0x2dc   :  { %v423_v25 = vsel %vm277_vm5, %v403_v23, %v422_v40 }
 0x2dd   :  { %v407_v20 = vadd.f32 %v406_v16, %v405_v14 }
 0x2df   :  { %v408_v22 = vrot.slane %v407_v20, 1 }
 0x2e1   :  { %v409_v24 = vadd.f32 %v408_v22, %v407_v20 }
 0x2e3   :  { %v424_v26 = vsel %vm279_vm6, %v409_v24, %v423_v25 }
 0x2e4   :  { %426 = vst [vmem:[#allocation8] sm:$0xff] %v424_v26 }
 0x2e5   :  { %438 = dma.vmem_to_hbm [thread:$0]  %s434_s23, 128, %s436_s26, [#allocation4]  }
 0x2e6   :  { %651 = dma.done.wait [#allocation4], 128  }
 0x2e7   :  { %652 = vsyncadd [#allocation4], 4294967168 }
 0x2e8   :  { %653 = dma.done.wait [#allocation10], 128  }
 0x2e9   :  { %654 = vsyncadd [#allocation10], 4294967168 }
 0x2ea   :  { %458 = vsyncpa [#allocation3], 1 }
 0x2eb   :  { %459 = vsyncpa [#allocation6], 1 }
 0x2ec   :  { %460 = vsyncpa [#allocation4], 1 }
 0x2ed   :  { %461 = vsyncpa [#allocation10], 1 }

</bundles_post_ra>
